<compile_context>
chip_gen: v6e
topology: v6e:2x2x1
jax: 0.10.0
libtpu: 0.0.40
codegen_flags: <defaults>
</compile_context>

<pallas_src>
import functools

import numpy as np

import jax
import jax.numpy as jnp
from jax.experimental import pallas as pl
from jax.experimental.pallas import tpu as pltpu

EPS = 0.0          # GINConv default eps
LANE = 128         # TPU lane width
MAX_TILE = 2048    # max adjacency tile edge (int8 tile = 4 MiB, 2x buffered)


def _round_up(v, m):
    return (v + m - 1) // m * m


def _pick_tiles(n):
    """Power-of-two tiles up to MAX_TILE.

    tk (reduction/lane axis of A) is as large as fits; tm (row axis) is halved
    if that is needed to give v7x's second TensorCore at least one row block.
    """
    n_lane = _round_up(n, LANE)
    tk = LANE
    while tk * 2 <= MAX_TILE and tk * 2 <= n_lane:
        tk *= 2
    tm = tk
    if _round_up(n, tk) // tm < 2 and tm > LANE:
        tm //= 2
    n_p = _round_up(n, tk)          # tm divides tk, so n_p % tm == 0 too
    return tm, tk, n_p


def _block_schedule(edge_index, tm, tk, n_p):
    """Host-side block-sparsity schedule.

    For every row block i: kmap[i, kk] = k index of the kk-th non-empty
    adjacency tile (padded by repeating the last index, so Pallas skips the
    re-fetch), nnz[i] = number of non-empty tiles.  Needs concrete edges.
    """
    e = np.asarray(edge_index)
    src, dst = e[0], e[1]
    num_i = n_p // tm
    num_k = n_p // tk
    present = np.zeros((num_i, num_k), dtype=bool)
    if src.size:
        present[dst // tm, src // tk] = True
    nnz = present.sum(axis=1).astype(np.int32)
    max_k = max(int(nnz.max()) if nnz.size else 0, 1)
    # TODO(synk): for very large graphs flatten kmap to 1D (SMEM 2D padding).
    kmap = np.zeros((num_i, max_k), dtype=np.int32)
    for i in range(num_i):
        ks = np.flatnonzero(present[i])
        if ks.size:
            kmap[i, :ks.size] = ks
            kmap[i, ks.size:] = ks[-1]
    return jnp.asarray(kmap), jnp.asarray(nnz)


def gin_kernel(kmap_ref, nnz_ref, adj_ref, x_nb_ref, x_self_ref,
               w1_ref, b1_ref, w2_ref, b2_ref, out_ref, acc_ref):
    del kmap_ref  # only used by the index_maps
    i = pl.program_id(0)
    kk = pl.program_id(1)

    @pl.when(kk == 0)
    def _():
        acc_ref[...] = jnp.zeros_like(acc_ref)

    # Partial neighborhood sum for the kk-th non-empty adjacency tile of this
    # row block: int8 tile -> bf16 on the VPU (free under the DMA), MXU matmul
    # with f32 accumulation.  Padded schedule steps (kk >= nnz[i]) are skipped.
    @pl.when(kk < nnz_ref[i])
    def _():
        a = adj_ref[...].astype(jnp.bfloat16)
        acc_ref[...] += jnp.dot(a, x_nb_ref[...],
                                preferred_element_type=jnp.float32)

    # Finalize once per row block: self term + 2-layer MLP, lane-dense store.
    @pl.when(kk == pl.num_programs(1) - 1)
    def _():
        h = acc_ref[...] + (1.0 + EPS) * x_self_ref[...].astype(jnp.float32)
        h1 = jnp.dot(h.astype(jnp.bfloat16), w1_ref[...],
                     preferred_element_type=jnp.float32)
        h1 = jnp.maximum(h1 + b1_ref[...], 0.0)
        out = jnp.dot(h1.astype(jnp.bfloat16), w2_ref[...],
                      preferred_element_type=jnp.float32)
        out_ref[...] = (out + b2_ref[...]).astype(out_ref.dtype)


@functools.partial(jax.jit, static_argnames=("tm", "tk", "n_p"))
def _gin_forward(x, edge_index, kmap, nnz, w1, b1, w2, b2, *, tm, tk, n_p):
    n, c_in = x.shape
    c_out = w1.shape[1]
    c_in_p = _round_up(c_in, LANE)
    c_out_p = _round_up(c_out, LANE)
    num_i = n_p // tm
    max_k = kmap.shape[1]

    src = edge_index[0]
    dst = edge_index[1]

    # Adjacency built directly in its storage dtype (int8, single HBM pass).
    # Duplicate edges accumulate (sum aggregation); exact for multiplicity <= 127.
    adj = jnp.zeros((n_p, n_p), jnp.int8).at[dst, src].add(jnp.int8(1))

    # Single bf16 copy of x, reused for neighbor tiles and the self term.
    x_bf = jnp.zeros((n_p, c_in_p), jnp.bfloat16).at[:n, :c_in].set(
        x.astype(jnp.bfloat16))

    w1_p = jnp.zeros((c_in_p, c_out_p), jnp.bfloat16).at[:c_in, :c_out].set(
        w1.astype(jnp.bfloat16))
    w2_p = jnp.zeros((c_out_p, c_out_p), jnp.bfloat16).at[:c_out, :c_out].set(
        w2.astype(jnp.bfloat16))
    b1_p = jnp.zeros((1, c_out_p), jnp.float32).at[0, :c_out].set(b1)
    b2_p = jnp.zeros((1, c_out_p), jnp.float32).at[0, :c_out].set(b2)

    grid_spec = pltpu.PrefetchScalarGridSpec(
        num_scalar_prefetch=2,                      # kmap, nnz -> SMEM
        grid=(num_i, max_k),
        in_specs=[
            # Adjacency tile: data-dependent k; repeated indices skip the DMA.
            pl.BlockSpec((tm, tk),
                         lambda i, kk, kmap, nnz: (i, kmap[i, kk])),
            # Neighbor rows of x for that k tile.
            pl.BlockSpec((tk, c_in_p),
                         lambda i, kk, kmap, nnz: (kmap[i, kk], 0)),
            # Self rows of x (resident across the reduction axis).
            pl.BlockSpec((tm, c_in_p),
                         lambda i, kk, kmap, nnz: (i, 0)),
            # Tiny resident weights / biases.
            pl.BlockSpec((c_in_p, c_out_p), lambda i, kk, kmap, nnz: (0, 0)),
            pl.BlockSpec((1, c_out_p), lambda i, kk, kmap, nnz: (0, 0)),
            pl.BlockSpec((c_out_p, c_out_p), lambda i, kk, kmap, nnz: (0, 0)),
            pl.BlockSpec((1, c_out_p), lambda i, kk, kmap, nnz: (0, 0)),
        ],
        out_specs=pl.BlockSpec((tm, c_out_p), lambda i, kk, kmap, nnz: (i, 0)),
        scratch_shapes=[pltpu.VMEM((tm, c_in_p), jnp.float32)],
    )

    out_p = pl.pallas_call(
        gin_kernel,
        out_shape=jax.ShapeDtypeStruct((n_p, c_out_p), jnp.float32),
        grid_spec=grid_spec,
        compiler_params=pltpu.CompilerParams(
            dimension_semantics=("parallel", "arbitrary"),
            vmem_limit_bytes=48 * 1024 * 1024,   # headroom on v7x's 64 MiB VMEM
        ),
    )(kmap, nnz, adj, x_bf, x_bf, w1_p, b1_p, w2_p, b2_p)

    # Padded rows/cols hold relu(b1)@W2 + b2 garbage — never reuse out_p raw.
    return out_p[:n, :c_out]


def gin_layer(x, edge_index, w1, b1, w2, b2, *, num_nodes):
    """x: [N, Cin] f32, edge_index: [2, E] int32 (row 0 = src, row 1 = dst)."""
    n, _ = x.shape
    if n != num_nodes:
        raise ValueError("x row count must equal num_nodes")
    tm, tk, n_p = _pick_tiles(n)
    # Block-sparsity schedule needs concrete edges (host side, outside jit).
    kmap, nnz = _block_schedule(edge_index, tm, tk, n_p)
    return _gin_forward(x, edge_index, kmap, nnz, w1, b1, w2, b2,
                        tm=tm, tk=tk, n_p=n_p)


def init_params(key, in_channels, out_channels):
    """Deterministic PyTorch-style Linear init: U(-1/sqrt(fan_in), 1/sqrt(fan_in))."""
    k1, k2, k3, k4 = jax.random.split(key, 4)
    lim1 = 1.0 / jnp.sqrt(in_channels)
    lim2 = 1.0 / jnp.sqrt(out_channels)
    # stored already transposed to [in, out] for the kernel
    w1 = jax.random.uniform(k1, (in_channels, out_channels), jnp.float32, -lim1, lim1)
    b1 = jax.random.uniform(k2, (out_channels,), jnp.float32, -lim1, lim1)
    w2 = jax.random.uniform(k3, (out_channels, out_channels), jnp.float32, -lim2, lim2)
    b2 = jax.random.uniform(k4, (out_channels,), jnp.float32, -lim2, lim2)
    return w1, b1, w2, b2


if __name__ == "__main__":
    key = jax.random.PRNGKey(0)
    k_x, k_e, k_p = jax.random.split(key, 3)

    num_nodes = 16
    num_edges = 40
    in_channels = 8
    out_channels = 32

    x = jax.random.normal(k_x, (num_nodes, in_channels), jnp.float32)
    edge_index = jax.random.randint(k_e, (2, num_edges), 0, num_nodes, jnp.int32)

    w1, b1, w2, b2 = init_params(k_p, in_channels, out_channels)

    out = gin_layer(x, edge_index, w1, b1, w2, b2, num_nodes=num_nodes)
    jax.block_until_ready(out)

    # Matched-numerics pure-JAX reference (bf16 features / h / weights where the
    # kernel uses bf16, f32 accumulation) of the same GINConv semantics.
    src, dst = edge_index[0], edge_index[1]
    bf = lambda v: v.astype(jnp.bfloat16).astype(jnp.float32)
    x_b = bf(x)
    agg = jnp.zeros_like(x).at[dst].add(x_b[src])
    h = (1.0 + EPS) * x_b + agg
    h1 = jnp.maximum(bf(h) @ bf(w1) + b1, 0.0)
    ref = bf(h1) @ bf(w2) + b2

    assert out.shape == (num_nodes, out_channels)
    assert jnp.allclose(out, ref, atol=2e-3, rtol=2e-3), \
        float(jnp.max(jnp.abs(out - ref)))

    # Looser sanity check against the full-f32 GINConv reference (quantifies
    # the documented bf16 approximation of the compute path).
    agg_f32 = jnp.zeros_like(x).at[dst].add(x[src])
    ref_f32 = jnp.maximum(((1.0 + EPS) * x + agg_f32) @ w1 + b1, 0.0) @ w2 + b2
    assert jnp.allclose(out, ref_f32, atol=1e-1, rtol=1e-1), \
        float(jnp.max(jnp.abs(out - ref_f32)))

    print("KERNEL_OK")
</pallas_src>

<mosaic_0001>
module attributes {stable_mosaic.version = 11 : i64} {
  func.func @gin_kernel(%arg0: i32, %arg1: i32, %arg2: memref<1x1xi32, #tpu.memory_space<smem>>, %arg3: memref<1xi32, #tpu.memory_space<smem>>, %arg4: memref<128x128xi8, #tpu.memory_space<vmem>>, %arg5: memref<128x128xbf16, #tpu.memory_space<vmem>>, %arg6: memref<128x128xbf16, #tpu.memory_space<vmem>>, %arg7: memref<128x128xbf16, #tpu.memory_space<vmem>>, %arg8: memref<1x128xf32, #tpu.memory_space<vmem>>, %arg9: memref<128x128xbf16, #tpu.memory_space<vmem>>, %arg10: memref<1x128xf32, #tpu.memory_space<vmem>>, %arg11: memref<128x128xf32, #tpu.memory_space<vmem>>, %arg12: memref<128x128xf32, #tpu.memory_space<vmem>>) attributes {dimension_semantics = [#tpu.dimension_semantics<parallel>, #tpu.dimension_semantics<arbitrary>], iteration_bounds = array<i64: 1, 1>, scalar_prefetch = 2 : i64, scratch_operands = 1 : i64, tpu.core_type = #tpu.core_type<tc>, window_params = [{transform_indices = @transform_0, window_bounds = array<i64: 128, 128>}, {transform_indices = @transform_1, window_bounds = array<i64: 128, 128>}, {transform_indices = @transform_2, window_bounds = array<i64: 128, 128>}, {pipeline_mode = #tpu.pipeline_mode<synchronous>, transform_indices = @transform_3, window_bounds = array<i64: 128, 128>}, {pipeline_mode = #tpu.pipeline_mode<synchronous>, transform_indices = @transform_4, window_bounds = array<i64: 1, 128>}, {pipeline_mode = #tpu.pipeline_mode<synchronous>, transform_indices = @transform_5, window_bounds = array<i64: 128, 128>}, {pipeline_mode = #tpu.pipeline_mode<synchronous>, transform_indices = @transform_6, window_bounds = array<i64: 1, 128>}, {transform_indices = @transform_7, window_bounds = array<i64: 128, 128>}]} {
    %c0_i32 = arith.constant 0 : i32
    %0 = arith.cmpi eq, %arg1, %c0_i32 : i32
    %1 = arith.extui %0 : i1 to i32
    %c0_i32_0 = arith.constant 0 : i32
    %2 = arith.cmpi ne, %1, %c0_i32_0 : i32
    scf.if %2 {
      %cst = arith.constant 0.000000e+00 : f32
      %11 = vector.broadcast %cst : f32 to vector<128x128xf32>
      %c0 = arith.constant 0 : index
      %c0_4 = arith.constant 0 : index
      %12 = vector.load %arg12[%c0, %c0_4] : memref<128x128xf32, #tpu.memory_space<vmem>>, vector<128x128xf32>
      tpu.vector_store %arg12[%c0, %c0_4], %11 {strides = array<i32>} : memref<128x128xf32, #tpu.memory_space<vmem>>, vector<128x128xf32>,
    } else {
    }
    %3 = arith.index_cast %arg0 : i32 to index
    %4 = memref.load %arg3[%3] : memref<1xi32, #tpu.memory_space<smem>>
    %5 = arith.cmpi slt, %arg1, %4 : i32
    %6 = arith.extui %5 : i1 to i32
    %c0_i32_1 = arith.constant 0 : i32
    %7 = arith.cmpi ne, %6, %c0_i32_1 : i32
    scf.if %7 {
      %c0 = arith.constant 0 : index
      %c0_4 = arith.constant 0 : index
      %11 = vector.load %arg4[%c0, %c0_4] : memref<128x128xi8, #tpu.memory_space<vmem>>, vector<128x128xi8>
      %12 = arith.sitofp %11 : vector<128x128xi8> to vector<128x128xbf16>
      %c0_5 = arith.constant 0 : index
      %c0_6 = arith.constant 0 : index
      %13 = vector.load %arg12[%c0_5, %c0_6] : memref<128x128xf32, #tpu.memory_space<vmem>>, vector<128x128xf32>
      %c0_7 = arith.constant 0 : index
      %c0_8 = arith.constant 0 : index
      %14 = vector.load %arg5[%c0_7, %c0_8] : memref<128x128xbf16, #tpu.memory_space<vmem>>, vector<128x128xbf16>
      %cst = arith.constant dense<0.000000e+00> : vector<128x128xf32>
      %15 = tpu.matmul %12, %14, %cst {dimension_numbers = #tpu.dot_dimension_numbers<[1], [0], [0], [1], [0, 0, 1, 1], [], []>} : vector<128x128xbf16>, vector<128x128xbf16>, vector<128x128xf32> -> vector<128x128xf32>
      %16 = arith.addf %13, %15 : vector<128x128xf32>
      %c0_9 = arith.constant 0 : index
      %c0_10 = arith.constant 0 : index
      %17 = vector.load %arg12[%c0_9, %c0_10] : memref<128x128xf32, #tpu.memory_space<vmem>>, vector<128x128xf32>
      tpu.vector_store %arg12[%c0_9, %c0_10], %16 {strides = array<i32>} : memref<128x128xf32, #tpu.memory_space<vmem>>, vector<128x128xf32>,
    } else {
    }
    %c0_i32_2 = arith.constant 0 : i32
    %8 = arith.cmpi eq, %arg1, %c0_i32_2 : i32
    %9 = arith.extui %8 : i1 to i32
    %c0_i32_3 = arith.constant 0 : i32
    %10 = arith.cmpi ne, %9, %c0_i32_3 : i32
    scf.if %10 {
      %c0 = arith.constant 0 : index
      %c0_4 = arith.constant 0 : index
      %11 = vector.load %arg12[%c0, %c0_4] : memref<128x128xf32, #tpu.memory_space<vmem>>, vector<128x128xf32>
      %c0_5 = arith.constant 0 : index
      %c0_6 = arith.constant 0 : index
      %12 = vector.load %arg6[%c0_5, %c0_6] : memref<128x128xbf16, #tpu.memory_space<vmem>>, vector<128x128xbf16>
      %13 = arith.extf %12 : vector<128x128xbf16> to vector<128x128xf32>
      %cst = arith.constant 1.000000e+00 : f32
      %14 = vector.broadcast %cst : f32 to vector<128x128xf32>
      %15 = arith.mulf %14, %13 : vector<128x128xf32>
      %16 = arith.addf %11, %15 : vector<128x128xf32>
      %17 = arith.truncf %16 : vector<128x128xf32> to vector<128x128xbf16>
      %c0_7 = arith.constant 0 : index
      %c0_8 = arith.constant 0 : index
      %18 = vector.load %arg7[%c0_7, %c0_8] : memref<128x128xbf16, #tpu.memory_space<vmem>>, vector<128x128xbf16>
      %cst_9 = arith.constant dense<0.000000e+00> : vector<128x128xf32>
      %19 = tpu.matmul %17, %18, %cst_9 {dimension_numbers = #tpu.dot_dimension_numbers<[1], [0], [0], [1], [0, 0, 1, 1], [], []>} : vector<128x128xbf16>, vector<128x128xbf16>, vector<128x128xf32> -> vector<128x128xf32>
      %c0_10 = arith.constant 0 : index
      %c0_11 = arith.constant 0 : index
      %20 = vector.load %arg8[%c0_10, %c0_11] : memref<1x128xf32, #tpu.memory_space<vmem>>, vector<1x128xf32>
      %21 = vector.broadcast %20 : vector<1x128xf32> to vector<128x128xf32>
      %22 = arith.addf %19, %21 : vector<128x128xf32>
      %cst_12 = arith.constant 0.000000e+00 : f32
      %23 = vector.broadcast %cst_12 : f32 to vector<128x128xf32>
      %24 = arith.maximumf %22, %23 : vector<128x128xf32>
      %25 = arith.truncf %24 : vector<128x128xf32> to vector<128x128xbf16>
      %c0_13 = arith.constant 0 : index
      %c0_14 = arith.constant 0 : index
      %26 = vector.load %arg9[%c0_13, %c0_14] : memref<128x128xbf16, #tpu.memory_space<vmem>>, vector<128x128xbf16>
      %cst_15 = arith.constant dense<0.000000e+00> : vector<128x128xf32>
      %27 = tpu.matmul %25, %26, %cst_15 {dimension_numbers = #tpu.dot_dimension_numbers<[1], [0], [0], [1], [0, 0, 1, 1], [], []>} : vector<128x128xbf16>, vector<128x128xbf16>, vector<128x128xf32> -> vector<128x128xf32>
      %c0_16 = arith.constant 0 : index
      %c0_17 = arith.constant 0 : index
      %28 = vector.load %arg10[%c0_16, %c0_17] : memref<1x128xf32, #tpu.memory_space<vmem>>, vector<1x128xf32>
      %29 = vector.broadcast %28 : vector<1x128xf32> to vector<128x128xf32>
      %30 = arith.addf %27, %29 : vector<128x128xf32>
      %c0_18 = arith.constant 0 : index
      %c0_19 = arith.constant 0 : index
      %31 = vector.load %arg11[%c0_18, %c0_19] : memref<128x128xf32, #tpu.memory_space<vmem>>, vector<128x128xf32>
      tpu.vector_store %arg11[%c0_18, %c0_19], %30 {strides = array<i32>} : memref<128x128xf32, #tpu.memory_space<vmem>>, vector<128x128xf32>,
    } else {
    }
    return
  }
  func.func @transform_0(%arg0: i32, %arg1: i32, %arg2: memref<1x1xi32, #tpu.memory_space<smem>>, %arg3: memref<1xi32, #tpu.memory_space<smem>>) -> (i32, i32) {
    %0 = arith.index_cast %arg0 : i32 to index
    %1 = arith.index_cast %arg1 : i32 to index
    %2 = memref.load %arg2[%0, %1] : memref<1x1xi32, #tpu.memory_space<smem>>
    %c0_i32 = arith.constant 0 : i32
    return %arg0, %2 : i32, i32
  }
  func.func @transform_1(%arg0: i32, %arg1: i32, %arg2: memref<1x1xi32, #tpu.memory_space<smem>>, %arg3: memref<1xi32, #tpu.memory_space<smem>>) -> (i32, i32) {
    %0 = arith.index_cast %arg0 : i32 to index
    %1 = arith.index_cast %arg1 : i32 to index
    %2 = memref.load %arg2[%0, %1] : memref<1x1xi32, #tpu.memory_space<smem>>
    %c0_i32 = arith.constant 0 : i32
    %c0_i32_0 = arith.constant 0 : i32
    return %2, %c0_i32 : i32, i32
  }
  func.func @transform_2(%arg0: i32, %arg1: i32, %arg2: memref<1x1xi32, #tpu.memory_space<smem>>, %arg3: memref<1xi32, #tpu.memory_space<smem>>) -> (i32, i32) {
    %c0_i32 = arith.constant 0 : i32
    %c0_i32_0 = arith.constant 0 : i32
    return %arg0, %c0_i32 : i32, i32
  }
  func.func @transform_3(%arg0: i32, %arg1: i32, %arg2: memref<1x1xi32, #tpu.memory_space<smem>>, %arg3: memref<1xi32, #tpu.memory_space<smem>>) -> (i32, i32) {
    %c0_i32 = arith.constant 0 : i32
    %c0_i32_0 = arith.constant 0 : i32
    %c0_i32_1 = arith.constant 0 : i32
    return %c0_i32, %c0_i32_0 : i32, i32
  }
  func.func @transform_4(%arg0: i32, %arg1: i32, %arg2: memref<1x1xi32, #tpu.memory_space<smem>>, %arg3: memref<1xi32, #tpu.memory_space<smem>>) -> (i32, i32) {
    %c0_i32 = arith.constant 0 : i32
    %c0_i32_0 = arith.constant 0 : i32
    %c0_i32_1 = arith.constant 0 : i32
    return %c0_i32, %c0_i32_0 : i32, i32
  }
  func.func @transform_5(%arg0: i32, %arg1: i32, %arg2: memref<1x1xi32, #tpu.memory_space<smem>>, %arg3: memref<1xi32, #tpu.memory_space<smem>>) -> (i32, i32) {
    %c0_i32 = arith.constant 0 : i32
    %c0_i32_0 = arith.constant 0 : i32
    %c0_i32_1 = arith.constant 0 : i32
    return %c0_i32, %c0_i32_0 : i32, i32
  }
  func.func @transform_6(%arg0: i32, %arg1: i32, %arg2: memref<1x1xi32, #tpu.memory_space<smem>>, %arg3: memref<1xi32, #tpu.memory_space<smem>>) -> (i32, i32) {
    %c0_i32 = arith.constant 0 : i32
    %c0_i32_0 = arith.constant 0 : i32
    %c0_i32_1 = arith.constant 0 : i32
    return %c0_i32, %c0_i32_0 : i32, i32
  }
  func.func @transform_7(%arg0: i32, %arg1: i32, %arg2: memref<1x1xi32, #tpu.memory_space<smem>>, %arg3: memref<1xi32, #tpu.memory_space<smem>>) -> (i32, i32) {
    %c0_i32 = arith.constant 0 : i32
    %c0_i32_0 = arith.constant 0 : i32
    return %arg0, %c0_i32 : i32, i32
  }
}

</mosaic_0001>

<bundles_post_ra>
// kernel: _gin_forward.1
= control target key start
LH: loop header
LB: loop body
LE: loop exit
PB: predicated region body
PF: predicated region fallthrough
CT: control target
= control target key end

     0   :  { %v1144_v0 = vmov 0.0   ;;  %s1371_s0 = inlined_call_operand.<no memory space> [shape: s32[1,1], index: 0, kind: input, shape index: {}]   ;;  %s1372_s1 = inlined_call_operand.<no memory space> [shape: s32[1], index: 1, kind: input, shape index: {}]   ;;  %s1373_s4 = inlined_call_operand.vmem [shape: bf16[128,128], index: 4, kind: input, shape index: {}, may-alias: {3,4}]   ;;  %s1374_s5 = inlined_call_operand.vmem [shape: bf16[128,128], index: 5, kind: input, shape index: {}]   ;;  %s1375_s6 = inlined_call_operand.vmem [shape: f32[1,128], index: 6, kind: input, shape index: {}]   ;;  %s1376_s7 = inlined_call_operand.vmem [shape: bf16[128,128], index: 7, kind: input, shape index: {}]   ;;  %s1377_s8 = inlined_call_operand.vmem [shape: f32[1,128], index: 8, kind: input, shape index: {}]   ;;  %s1378_s9 = inlined_call_operand.vmem [shape: f32[128,128], index: 9, kind: output, shape index: {}]   ;;  %s1379_s2 = inlined_call_operand.vmem [shape: s8[128,128], index: 2, kind: input, shape index: {}]   ;;  %s1380_s3 = inlined_call_operand.vmem [shape: bf16[128,128], index: 3, kind: input, shape index: {}, may-alias: {3,4}]  }
   0x1   :  { %p77_p0 = scmp.lt.s32.totalorder %s1371_s0, 0  ;;  %s882_s13 = sshll.u32 %s1371_s0, 4  ;;  %104 = vst [vmem:[#allocation2 + $0x30] sm:$0xff] %v1144_v0  ;;  %105 = vst [vmem:[#allocation2] sm:$0xff] %v1144_v0 }
   0x2   :  { %106 = vst [vmem:[#allocation2 + $0x58] sm:$0xff] %v1144_v0  ;;  %107 = vst [vmem:[#allocation2 + $0x18] sm:$0xff] %v1144_v0  ;;  %p90_p1 = scmp.lt.s32.totalorder %s882_s13, 15  ;;  %p885_p2 = scmp.le.s32.totalorder %s1372_s1, 0 }
   0x3   :  { %108 = vst [vmem:[#allocation2 + $0x50] sm:$0xff] %v1144_v0  ;;  %109 = vst [vmem:[#allocation2 + $0x68] sm:$0xff] %v1144_v0  ;;  %s1382_s0 = smov (!%p77_p0, %s1371_s0), 0 }
   0x4   :  { %110 = vst [vmem:[#allocation2 + $0x8] sm:$0xff] %v1144_v0  ;;  %111 = vst [vmem:[#allocation2 + $0x48] sm:$0xff] %v1144_v0  ;;  %s1384_s13 = smov (!%p90_p1, %s882_s13), 15  ;;  %s881_s18 = sshll.u32 %s1382_s0, 1 }
   0x5   :  { %112 = vst [vmem:[#allocation2 + $0x40] sm:$0xff] %v1144_v0  ;;  %113 = vst [vmem:[#allocation2 + $0x20] sm:$0xff] %v1144_v0  ;;  %s1211_s21 = scalar_lea.vmem %s1379_s2, %s881_s18  ;;  %s883_s22 = sshll.u32 %s1384_s13, 2 }
   0x6   :  { %114 = vst [vmem:[#allocation2 + $0x10] sm:$0xff] %v1144_v0  ;;  %115 = vst [vmem:[#allocation2 + $0x38] sm:$0xff] %v1144_v0  ;;  %s1216_s25 = scalar_lea.vmem %s1380_s3, %s883_s22  ;;  %124 = sbr.rel (%p885_p2) target bundleno = 254 (0xfe), region = 37 }
   0x7   :  { %116 = vst [vmem:[#allocation2 + $0x60] sm:$0xff] %v1144_v0  ;;  %117 = vst [vmem:[#allocation2 + $0x70] sm:$0xff] %v1144_v0 }
   0x8   :  { %118 = vst [vmem:[#allocation2 + $0x78] sm:$0xff] %v1144_v0  ;;  %119 = vst [vmem:[#allocation2 + $0x28] sm:$0xff] %v1144_v0 }
   0xb   :  { %v1120_v1 = vld [vmem:[%s1216_s25 + $0x38] sm:$0xff]   ;;  %v1121_v2 = vld [vmem:[%s1216_s25 + $0x30] sm:$0xff]   ;;  %v1122_v3 = vld [vmem:[%s1216_s25 + $0x28] sm:$0xff]  }
   0xc   :  { %1007 = vmatprep.subr.bf16.mxu0 %v1120_v1  ;;  %1103 = vmatprep.subr.bf16.mxu1 %v1120_v1  ;;  %v1123_v4 = vld [vmem:[%s1216_s25 + $0x20] sm:$0xff]   ;;  %v133_v7 = vld [vmem:[%s1211_s21 + $0x10] sm:$0x3]  ;;  %v134_v10 = vld [vmem:[%s1211_s21 + $0x12] sm:$0x3] }
   0xd   :  { %1008 = vmatpush3.bf16.msra.mxu0 %v1120_v1  ;;  %1111 = vmatpush3.bf16.msra.mxu1 %v1120_v1  ;;  %v125_v5 = vld [vmem:[%s1211_s21] sm:$0x3]  ;;  %v126_v6 = vld [vmem:[%s1211_s21 + $0x2] sm:$0x3]  ;;  %v149_v11 = vunpack.c.l.s8.bf16 %v133_v7  ;;  %v150_v12 = vunpack.c.l.s8.bf16 %v134_v10  ;;  %v1124_v14 = vld [vmem:[%s1216_s25 + $0x18] sm:$0xff]  }
   0xe   :  { %1009 = vmatprep.subr.bf16.mxu0 %v1121_v2  ;;  %1104 = vmatprep.subr.bf16.mxu1 %v1121_v2  ;;  %v141_v8 = vunpack.c.l.s8.bf16 %v125_v5  ;;  %v142_v9 = vunpack.c.l.s8.bf16 %v126_v6  ;;  %v1125_v16 = vld [vmem:[%s1216_s25 + $0x10] sm:$0xff]   ;;  %v1126_v17 = vld [vmem:[%s1216_s25 + $0x8] sm:$0xff]   ;;  %v1127_v18 = vld [vmem:[%s1216_s25] sm:$0xff]  }
   0xf   :  { %v890_v15 = vcombine.low %v149_v11, %v150_v12  ;;  %v127_v19 = vld [vmem:[%s1211_s21 + $0x4] sm:$0x3]  ;;  %v128_v20 = vld [vmem:[%s1211_s21 + $0x6] sm:$0x3]  ;;  %v135_v21 = vld [vmem:[%s1211_s21 + $0x14] sm:$0x3] }
  0x10   :  { %v886_v13 = vcombine.low %v141_v8, %v142_v9  ;;  %v136_v22 = vld [vmem:[%s1211_s21 + $0x16] sm:$0x3]  ;;  %v129_v23 = vld [vmem:[%s1211_s21 + $0x8] sm:$0x3]  ;;  %v130_v24 = vld [vmem:[%s1211_s21 + $0xa] sm:$0x3]  ;;  %v143_v27 = vunpack.c.l.s8.bf16 %v127_v19  ;;  %v144_v28 = vunpack.c.l.s8.bf16 %v128_v20  ;;  %v151_v29 = vunpack.c.l.s8.bf16 %v135_v21 }
  0x11   :  { %1010 = vmatpush3.bf16.msra.mxu0 %v1121_v2  ;;  %1112 = vmatpush3.bf16.msra.mxu1 %v1121_v2  ;;  %v137_v25 = vld [vmem:[%s1211_s21 + $0x18] sm:$0x3]  ;;  %v138_v26 = vld [vmem:[%s1211_s21 + $0x1a] sm:$0x3]  ;;  %v152_v30 = vunpack.c.l.s8.bf16 %v136_v22  ;;  %v145_v31 = vunpack.c.l.s8.bf16 %v129_v23  ;;  %v146_v32 = vunpack.c.l.s8.bf16 %v130_v24  ;;  %v131_v37 = vld [vmem:[%s1211_s21 + $0xc] sm:$0x3] }
  0x12   :  { %1011 = vmatprep.subr.bf16.mxu0 %v1122_v3  ;;  %1105 = vmatprep.subr.bf16.mxu1 %v1122_v3  ;;  %v153_v33 = vunpack.c.l.s8.bf16 %v137_v25  ;;  %v154_v34 = vunpack.c.l.s8.bf16 %v138_v26  ;;  %v887_v35 = vcombine.low %v143_v27, %v144_v28  ;;  %v132_v40 = vld [vmem:[%s1211_s21 + $0xe] sm:$0x3]  ;;  %v139_v41 = vld [vmem:[%s1211_s21 + $0x1c] sm:$0x3]  ;;  %v140_v42 = vld [vmem:[%s1211_s21 + $0x1e] sm:$0x3]  ;;  %v147_v43 = vunpack.c.l.s8.bf16 %v131_v37 }
  0x13   :  { %1023 = vmatprep.mubr.bf16.mxu0 %v886_v13  ;;  %1031 = vmatprep.mubr.bf16.mxu1 %v890_v15  ;;  %v891_v36 = vcombine.low %v151_v29, %v152_v30  ;;  %v888_v38 = vcombine.low %v145_v31, %v146_v32  ;;  %v148_v44 = vunpack.c.l.s8.bf16 %v132_v40  ;;  %v155_v45 = vunpack.c.l.s8.bf16 %v139_v41  ;;  %v159_v49 = vld [vmem:[#allocation2 + $0x58] sm:$0xff]  ;;  %v167_v50 = vld [vmem:[#allocation2 + $0x10] sm:$0xff]  ;;  %v165_v54 = vld [vmem:[#allocation2 + $0x40] sm:$0xff] }
  0x14   :  { %v892_v39 = vcombine.low %v153_v33, %v154_v34  ;;  %v156_v46 = vunpack.c.l.s8.bf16 %v140_v42  ;;  %v157_v53 = vld [vmem:[#allocation2 + $0x30] sm:$0xff]  ;;  %v160_v59 = vld [vmem:[#allocation2 + $0x18] sm:$0xff]  ;;  %v158_v1 = vld [vmem:[#allocation2] sm:$0xff] }
  0x15   :  { %1012 = vmatpush3.bf16.msra.mxu0 %v1122_v3  ;;  %1113 = vmatpush3.bf16.msra.mxu1 %v1122_v3  ;;  %v889_v47 = vcombine.low %v147_v43, %v148_v44  ;;  %v168_v60 = vld [vmem:[#allocation2 + $0x38] sm:$0xff]  ;;  %v166_v2 = vld [vmem:[#allocation2 + $0x20] sm:$0xff]  ;;  %v163_v7 = vld [vmem:[#allocation2 + $0x8] sm:$0xff] }
  0x16   :  { %1013 = vmatprep.subr.bf16.mxu0 %v1123_v4  ;;  %1106 = vmatprep.subr.bf16.mxu1 %v1123_v4  ;;  %v893_v48 = vcombine.low %v155_v45, %v156_v46  ;;  %v171_v8 = vld [vmem:[#allocation2 + $0x78] sm:$0xff]  ;;  %v161_v13 = vld [vmem:[#allocation2 + $0x50] sm:$0xff]  ;;  %v164_v19 = vld [vmem:[#allocation2 + $0x48] sm:$0xff] }
  0x17   :  { %v172_v20 = vld [vmem:[#allocation2 + $0x28] sm:$0xff]  ;;  %v170_v26 = vld [vmem:[#allocation2 + $0x70] sm:$0xff] }
  0x18   :  { %v162_v25 = vld [vmem:[#allocation2 + $0x68] sm:$0xff] }
  0x19   :  { %1014 = vmatpush3.bf16.msra.mxu0 %v1123_v4  ;;  %1114 = vmatpush3.bf16.msra.mxu1 %v1123_v4 }
  0x1a   :  { %1015 = vmatprep.subr.bf16.mxu0 %v1124_v14  ;;  %1107 = vmatprep.subr.bf16.mxu1 %v1124_v14 }
  0x1d   :  { %1016 = vmatpush3.bf16.msra.mxu0 %v1124_v14  ;;  %1115 = vmatpush3.bf16.msra.mxu1 %v1124_v14  ;;  %v169_v14 = vld [vmem:[#allocation2 + $0x60] sm:$0xff] }
  0x1e   :  { %1017 = vmatprep.subr.bf16.mxu0 %v1125_v16  ;;  %1108 = vmatprep.subr.bf16.mxu1 %v1125_v16 }
  0x21   :  { %1018 = vmatpush3.bf16.msra.mxu0 %v1125_v16  ;;  %1116 = vmatpush3.bf16.msra.mxu1 %v1125_v16 }
  0x22   :  { %1019 = vmatprep.subr.bf16.mxu0 %v1126_v17  ;;  %1109 = vmatprep.subr.bf16.mxu1 %v1126_v17 }
  0x25   :  { %1020 = vmatpush3.bf16.msra.mxu0 %v1126_v17  ;;  %1117 = vmatpush3.bf16.msra.mxu1 %v1126_v17 }
  0x26   :  { %1021 = vmatprep.subr.bf16.mxu0 %v1127_v18  ;;  %1110 = vmatprep.subr.bf16.mxu1 %v1127_v18 }
  0x29   :  { %1022 = vmatpush3.bf16.msra.mxu0 %v1127_v18  ;;  %1118 = vmatpush3.bf16.msra.mxu1 %v1127_v18 }
  0x2c   :  { %1024 = vmatmul.mubr.bf16.vlgmr.msra.gmra.mxu0 %v887_v35  ;;  %1032 = vmatmul.mubr.bf16.vlgmr.msra.gmra.mxu1 %v891_v36 }
  0x2d   :  { %1027 = vmatprep.mubr.bf16.mxu0 %v888_v38  ;;  %1035 = vmatprep.mubr.bf16.mxu1 %v892_v39 }
  0x34   :  { %1028 = vmatmul.mubr.bf16.gmra.mxu0 %v889_v47  ;;  %1036 = vmatmul.mubr.bf16.gmra.mxu1 %v893_v48 }
  0xec   :  { %v1025_v51 = vpop.f32.mrf.mxu0  ;;  %v1033_v52 = vpop.f32.mrf.mxu1 }
  0xed   :  { %v384_v55 = vadd.f32 %v1025_v51, %v159_v49  ;;  %v392_v56 = vadd.f32 %v1033_v52, %v167_v50 }
  0xee   :  { %v319_v57 = vpop.f32.mrf.mxu0  ;;  %v351_v58 = vpop.f32.mrf.mxu1 }
  0xef   :  { %400 = vst [vmem:[#allocation2 + $0x58] sm:$0xff] %v384_v55  ;;  %408 = vst [vmem:[#allocation2 + $0x10] sm:$0xff] %v392_v56  ;;  %v382_v61 = vadd.f32 %v319_v57, %v157_v53  ;;  %v390_v62 = vadd.f32 %v351_v58, %v165_v54 }
  0xf0   :  { %v1026_v63 = vpop.f32.mrf.mxu0  ;;  %v1034_v0 = vpop.f32.mrf.mxu1 }
  0xf1   :  { %398 = vst [vmem:[#allocation2 + $0x30] sm:$0xff] %v382_v61  ;;  %406 = vst [vmem:[#allocation2 + $0x40] sm:$0xff] %v390_v62  ;;  %v385_v3 = vadd.f32 %v1026_v63, %v160_v59  ;;  %v393_v4 = vadd.f32 %v1034_v0, %v168_v60 }
  0xf2   :  { %v322_v5 = vpop.f32.mrf.mxu0  ;;  %v354_v6 = vpop.f32.mrf.mxu1 }
  0xf3   :  { %401 = vst [vmem:[#allocation2 + $0x18] sm:$0xff] %v385_v3  ;;  %409 = vst [vmem:[#allocation2 + $0x38] sm:$0xff] %v393_v4  ;;  %v383_v9 = vadd.f32 %v322_v5, %v158_v1  ;;  %v391_v10 = vadd.f32 %v354_v6, %v166_v2 }
  0xf4   :  { %v1029_v11 = vpop.f32.mrf.mxu0  ;;  %v1037_v12 = vpop.f32.mrf.mxu1 }
  0xf5   :  { %399 = vst [vmem:[#allocation2] sm:$0xff] %v383_v9  ;;  %407 = vst [vmem:[#allocation2 + $0x20] sm:$0xff] %v391_v10  ;;  %v388_v15 = vadd.f32 %v1029_v11, %v163_v7  ;;  %v396_v16 = vadd.f32 %v1037_v12, %v171_v8 }
  0xf6   :  { %v335_v17 = vpop.f32.mrf.mxu0  ;;  %v367_v18 = vpop.f32.mrf.mxu1 }
  0xf7   :  { %404 = vst [vmem:[#allocation2 + $0x8] sm:$0xff] %v388_v15  ;;  %412 = vst [vmem:[#allocation2 + $0x78] sm:$0xff] %v396_v16  ;;  %v386_v21 = vadd.f32 %v335_v17, %v161_v13  ;;  %v394_v22 = vadd.f32 %v367_v18, %v169_v14 }
  0xf8   :  { %v1030_v23 = vpop.f32.mrf.mxu0  ;;  %v1038_v24 = vpop.f32.mrf.mxu1 }
  0xf9   :  { %402 = vst [vmem:[#allocation2 + $0x50] sm:$0xff] %v386_v21  ;;  %410 = vst [vmem:[#allocation2 + $0x60] sm:$0xff] %v394_v22  ;;  %v389_v27 = vadd.f32 %v1030_v23, %v164_v19  ;;  %v397_v28 = vadd.f32 %v1038_v24, %v172_v20 }
  0xfa   :  { %v338_v29 = vpop.f32.mrf.mxu0  ;;  %v370_v30 = vpop.f32.mrf.mxu1 }
  0xfb   :  { %405 = vst [vmem:[#allocation2 + $0x48] sm:$0xff] %v389_v27  ;;  %413 = vst [vmem:[#allocation2 + $0x28] sm:$0xff] %v397_v28  ;;  %v387_v31 = vadd.f32 %v338_v29, %v162_v25  ;;  %v395_v32 = vadd.f32 %v370_v30, %v170_v26 }
  0xfd   :  { %403 = vst [vmem:[#allocation2 + $0x68] sm:$0xff] %v387_v31  ;;  %411 = vst [vmem:[#allocation2 + $0x70] sm:$0xff] %v395_v32 }
  0xfe PF:  { %v1128_v33 = vld [vmem:[%s1374_s5 + $0x38] sm:$0xff]   ;;  %v1129_v34 = vld [vmem:[%s1374_s5 + $0x30] sm:$0xff]   ;;  %v1130_v35 = vld [vmem:[%s1374_s5 + $0x28] sm:$0xff]  }
  0xff   :  { %1039 = vmatprep.subr.bf16.mxu0 %v1128_v33  ;;  %v1131_v36 = vld [vmem:[%s1374_s5 + $0x20] sm:$0xff]   ;;  %v417_v37 = vld [vmem:[#allocation2 + $0x30] sm:$0xff]  ;;  %v1132_v44 = vld [vmem:[%s1374_s5 + $0x18] sm:$0xff]  }
 0x100   :  { %1040 = vmatpush3.bf16.msra.mxu0 %v1128_v33  ;;  %v418_v38 = vld [vmem:[#allocation2] sm:$0xff]  ;;  %v1133_v46 = vld [vmem:[%s1374_s5 + $0x10] sm:$0xff]   ;;  %v1136_v47 = vld [vmem:[%s1376_s7 + $0x38] sm:$0xff]  }
 0x101   :  { %1041 = vmatprep.subr.bf16.mxu0 %v1129_v34  ;;  %v921_v39 = vld [vmem:[%s1373_s4] sm:$0xff]   ;;  %v1137_v48 = vld [vmem:[%s1376_s7 + $0x30] sm:$0xff]   ;;  %v1134_v49 = vld [vmem:[%s1374_s5 + $0x8] sm:$0xff]   ;;  %1071 = vmatprep.subr.bf16.mxu1 %v1136_v47 }
 0x102   :  { %v922_v40 = vunpack.c.l.bf16 %v921_v39  ;;  %v923_v41 = vunpack.c.h.bf16 %v921_v39  ;;  %v952_v50 = vld [vmem:[%s1373_s4 + $0x8] sm:$0xff]   ;;  %v953_v51 = vld [vmem:[%s1373_s4 + $0x10] sm:$0xff]   ;;  %1072 = vmatpush3.bf16.msra.mxu1 %v1136_v47  ;;  %v1135_v55 = vld [vmem:[%s1374_s5] sm:$0xff]  }
 0x103   :  { %1073 = vmatprep.subr.bf16.mxu1 %v1137_v48  ;;  %v1138_v52 = vld [vmem:[%s1376_s7 + $0x28] sm:$0xff]   ;;  %v926_v53 = vunpack.c.l.bf16 %v952_v50  ;;  %v927_v54 = vunpack.c.h.bf16 %v952_v50  ;;  %v419_v56 = vld [vmem:[#allocation2 + $0x58] sm:$0xff]  ;;  %v930_v58 = vunpack.c.l.bf16 %v953_v51  ;;  %v931_v59 = vunpack.c.h.bf16 %v953_v51  ;;  %v421_v60 = vld [vmem:[#allocation2 + $0x50] sm:$0xff] }
 0x104   :  { %1042 = vmatpush3.bf16.msra.mxu0 %v1129_v34  ;;  %v465_v42 = vadd.f32 %v922_v40, %v417_v37  ;;  %v466_v43 = vadd.f32 %v923_v41, %v418_v38  ;;  %v420_v57 = vld [vmem:[#allocation2 + $0x18] sm:$0xff]  ;;  %v422_v61 = vld [vmem:[#allocation2 + $0x68] sm:$0xff]  ;;  %v1139_v62 = vld [vmem:[%s1376_s7 + $0x20] sm:$0xff]  }
 0x105   :  { %1043 = vmatprep.subr.bf16.mxu0 %v1130_v35  ;;  %v467_v63 = vadd.f32 %v926_v53, %v419_v56  ;;  %v468_v0 = vadd.f32 %v927_v54, %v420_v57  ;;  %v469_v1 = vadd.f32 %v930_v58, %v421_v60  ;;  %v470_v2 = vadd.f32 %v931_v59, %v422_v61  ;;  %v954_v3 = vld [vmem:[%s1373_s4 + $0x18] sm:$0xff]   ;;  %v955_v4 = vld [vmem:[%s1373_s4 + $0x20] sm:$0xff]   ;;  %v423_v10 = vld [vmem:[#allocation2 + $0x8] sm:$0xff] }
 0x106   :  { %v481_v45 = vpack.c.bf16 %v466_v43, %v465_v42  ;;  %1074 = vmatpush3.bf16.msra.mxu1 %v1137_v48  ;;  %v1140_v5 = vld [vmem:[%s1376_s7 + $0x18] sm:$0xff]   ;;  %v934_v7 = vunpack.c.l.bf16 %v954_v3  ;;  %v935_v8 = vunpack.c.h.bf16 %v954_v3  ;;  %v424_v11 = vld [vmem:[#allocation2 + $0x48] sm:$0xff]  ;;  %v938_v12 = vunpack.c.l.bf16 %v955_v4  ;;  %v425_v14 = vld [vmem:[#allocation2 + $0x40] sm:$0xff] }
 0x107   :  { %1075 = vmatprep.subr.bf16.mxu1 %v1138_v52  ;;  %v482_v6 = vpack.c.bf16 %v468_v0, %v467_v63  ;;  %v483_v9 = vpack.c.bf16 %v470_v2, %v469_v1  ;;  %v939_v13 = vunpack.c.h.bf16 %v955_v4  ;;  %v426_v15 = vld [vmem:[#allocation2 + $0x20] sm:$0xff]  ;;  %v956_v20 = vld [vmem:[%s1373_s4 + $0x28] sm:$0xff]   ;;  %v957_v21 = vld [vmem:[%s1373_s4 + $0x30] sm:$0xff]  }
 0x108   :  { %1044 = vmatpush3.bf16.msra.mxu0 %v1130_v35  ;;  %1055 = vmatprep.mubr.bf16.mxu0 %v481_v45  ;;  %v471_v16 = vadd.f32 %v934_v7, %v423_v10  ;;  %v472_v17 = vadd.f32 %v935_v8, %v424_v11  ;;  %v473_v18 = vadd.f32 %v938_v12, %v425_v14  ;;  %v942_v23 = vunpack.c.l.bf16 %v956_v20  ;;  %v427_v26 = vld [vmem:[#allocation2 + $0x10] sm:$0xff]  ;;  %v428_v27 = vld [vmem:[#allocation2 + $0x38] sm:$0xff]  ;;  %v429_v30 = vld [vmem:[#allocation2 + $0x60] sm:$0xff] }
 0x109   :  { %1045 = vmatprep.subr.bf16.mxu0 %v1131_v36  ;;  %v474_v19 = vadd.f32 %v939_v13, %v426_v15  ;;  %v943_v24 = vunpack.c.h.bf16 %v956_v20  ;;  %v946_v28 = vunpack.c.l.bf16 %v957_v21  ;;  %v947_v29 = vunpack.c.h.bf16 %v957_v21  ;;  %v430_v31 = vld [vmem:[#allocation2 + $0x70] sm:$0xff]  ;;  %v431_v41 = vld [vmem:[#allocation2 + $0x78] sm:$0xff]  ;;  %v432_v42 = vld [vmem:[#allocation2 + $0x28] sm:$0xff] }
 0x10a   :  { %1076 = vmatpush3.bf16.msra.mxu1 %v1138_v52  ;;  %v484_v22 = vpack.c.bf16 %v472_v17, %v471_v16  ;;  %v475_v32 = vadd.f32 %v942_v23, %v427_v26  ;;  %v1142_v47 = vld [vmem:[%s1376_s7 + $0x8] sm:$0xff]   ;;  %v1143_v48 = vld [vmem:[%s1376_s7] sm:$0xff]  }
 0x10b   :  { %1077 = vmatprep.subr.bf16.mxu1 %v1139_v62  ;;  %v485_v25 = vpack.c.bf16 %v474_v19, %v473_v18  ;;  %v476_v33 = vadd.f32 %v943_v24, %v428_v27  ;;  %v477_v34 = vadd.f32 %v946_v28, %v429_v30  ;;  %v478_v35 = vadd.f32 %v947_v29, %v430_v31  ;;  %v902_v51 = vld [vmem:[%s1375_s6] ss:$0 sm:$0xff] }
 0x10c   :  { %1046 = vmatpush3.bf16.msra.mxu0 %v1131_v36  ;;  %v958_v36 = vld [vmem:[%s1373_s4 + $0x38] sm:$0xff]  }
 0x10d   :  { %1047 = vmatprep.subr.bf16.mxu0 %v1132_v44  ;;  %v486_v37 = vpack.c.bf16 %v476_v33, %v475_v32  ;;  %v950_v38 = vunpack.c.l.bf16 %v958_v36  ;;  %v951_v39 = vunpack.c.h.bf16 %v958_v36  ;;  %v487_v40 = vpack.c.bf16 %v478_v35, %v477_v34 }
 0x10e   :  { %1078 = vmatpush3.bf16.msra.mxu1 %v1139_v62 }
 0x10f   :  { %1079 = vmatprep.subr.bf16.mxu1 %v1140_v5  ;;  %v479_v43 = vadd.f32 %v950_v38, %v431_v41 }
 0x110   :  { %1048 = vmatpush3.bf16.msra.mxu0 %v1132_v44  ;;  %v480_v44 = vadd.f32 %v951_v39, %v432_v42  ;;  %v911_v42 = vld [vmem:[%s1377_s8] ss:$0 sm:$0xff] }
 0x111   :  { %1049 = vmatprep.subr.bf16.mxu0 %v1133_v46 }
 0x112   :  { %1080 = vmatpush3.bf16.msra.mxu1 %v1140_v5  ;;  %v488_v45 = vpack.c.bf16 %v480_v44, %v479_v43 }
 0x114   :  { %1050 = vmatpush3.bf16.msra.mxu0 %v1133_v46  ;;  %v1141_v46 = vld [vmem:[%s1376_s7 + $0x10] sm:$0xff]  }
 0x115   :  { %1051 = vmatprep.subr.bf16.mxu0 %v1134_v49  ;;  %1081 = vmatprep.subr.bf16.mxu1 %v1141_v46 }
 0x116   :  { %1082 = vmatpush3.bf16.msra.mxu1 %v1141_v46 }
 0x117   :  { %1083 = vmatprep.subr.bf16.mxu1 %v1142_v47 }
 0x118   :  { %1052 = vmatpush3.bf16.msra.mxu0 %v1134_v49 }
 0x119   :  { %1053 = vmatprep.subr.bf16.mxu0 %v1135_v55 }
 0x11a   :  { %1084 = vmatpush3.bf16.msra.mxu1 %v1142_v47 }
 0x11b   :  { %1085 = vmatprep.subr.bf16.mxu1 %v1143_v48 }
 0x11c   :  { %1054 = vmatpush3.bf16.msra.mxu0 %v1135_v55 }
 0x11e   :  { %1086 = vmatpush3.bf16.msra.mxu1 %v1143_v48 }
 0x11f   :  { %1056 = vmatmul.mubr.bf16.vlgmr.msra.gmra.mxu0 %v482_v6 }
 0x120   :  { %1059 = vmatprep.mubr.bf16.mxu0 %v483_v9 }
 0x127   :  { %1060 = vmatmul.mubr.bf16.gmra.mxu0 %v484_v22 }
 0x128   :  { %1063 = vmatprep.mubr.bf16.mxu0 %v485_v25 }
 0x12f   :  { %1064 = vmatmul.mubr.bf16.gmra.mxu0 %v486_v37 }
 0x130   :  { %1067 = vmatprep.mubr.bf16.mxu0 %v487_v40 }
 0x137   :  { %1068 = vmatmul.mubr.bf16.gmra.mxu0 %v488_v45 }
 0x1df   :  { %v1057_v49 = vpop.f32.mrf.mxu0 }
 0x1e0   :  { %v603_v55 = vadd.f32 %v1057_v49, %v902_v51 }
 0x1e1   :  { %v594_v50 = vpop.f32.mrf.mxu0 }
 0x1e2   :  { %v595_v53 = vadd.f32 %v902_v51, %v594_v50  ;;  %v659_v62 = vmax.f32 %v603_v55, 0.0 }
 0x1e3   :  { %v1058_v52 = vpop.f32.mrf.mxu0 }
 0x1e4   :  { %v606_v54 = vadd.f32 %v1058_v52, %v902_v51  ;;  %v657_v60 = vmax.f32 %v595_v53, 0.0 }
 0x1e5   :  { %v597_v56 = vpop.f32.mrf.mxu0 }
 0x1e6   :  { %v598_v57 = vadd.f32 %v902_v51, %v597_v56  ;;  %v660_v58 = vmax.f32 %v606_v54, 0.0 }
 0x1e7   :  { %v1061_v59 = vpop.f32.mrf.mxu0 }
 0x1e8   :  { %v658_v61 = vmax.f32 %v598_v57, 0.0  ;;  %v674_v1 = vpack.c.bf16 %v660_v58, %v659_v62  ;;  %v619_v5 = vadd.f32 %v1061_v59, %v902_v51 }
 0x1e9   :  { %v610_v63 = vpop.f32.mrf.mxu0 }
 0x1ea   :  { %v673_v0 = vpack.c.bf16 %v658_v61, %v657_v60  ;;  %v611_v3 = vadd.f32 %v902_v51, %v610_v63  ;;  %v663_v12 = vmax.f32 %v619_v5, 0.0 }
 0x1eb   :  { %v1062_v2 = vpop.f32.mrf.mxu0 }
 0x1ec   :  { %v622_v4 = vadd.f32 %v1062_v2, %v902_v51  ;;  %1087 = vmatprep.mubr.bf16.mxu1 %v673_v0  ;;  %v661_v10 = vmax.f32 %v611_v3, 0.0 }
 0x1ed   :  { %v613_v6 = vpop.f32.mrf.mxu0  ;;  %1088 = vmatmul.mubr.bf16.vlgmr.msra.gmra.mxu1 %v674_v1 }
 0x1ee   :  { %v614_v7 = vadd.f32 %v902_v51, %v613_v6  ;;  %v664_v8 = vmax.f32 %v622_v4, 0.0 }
 0x1ef   :  { %v1065_v9 = vpop.f32.mrf.mxu0 }
 0x1f0   :  { %v662_v11 = vmax.f32 %v614_v7, 0.0  ;;  %v676_v15 = vpack.c.bf16 %v664_v8, %v663_v12  ;;  %v635_v19 = vadd.f32 %v1065_v9, %v902_v51 }
 0x1f1   :  { %v626_v13 = vpop.f32.mrf.mxu0 }
 0x1f2   :  { %v675_v14 = vpack.c.bf16 %v662_v11, %v661_v10  ;;  %v627_v17 = vadd.f32 %v902_v51, %v626_v13  ;;  %v667_v26 = vmax.f32 %v635_v19, 0.0 }
 0x1f3   :  { %v1066_v16 = vpop.f32.mrf.mxu0 }
 0x1f4   :  { %v638_v18 = vadd.f32 %v1066_v16, %v902_v51  ;;  %1091 = vmatprep.mubr.bf16.mxu1 %v675_v14  ;;  %v665_v24 = vmax.f32 %v627_v17, 0.0 }
 0x1f5   :  { %v629_v20 = vpop.f32.mrf.mxu0  ;;  %1092 = vmatmul.mubr.bf16.gmra.mxu1 %v676_v15 }
 0x1f6   :  { %v630_v21 = vadd.f32 %v902_v51, %v629_v20  ;;  %v668_v22 = vmax.f32 %v638_v18, 0.0 }
 0x1f7   :  { %v1069_v23 = vpop.f32.mrf.mxu0 }
 0x1f8   :  { %v666_v25 = vmax.f32 %v630_v21, 0.0  ;;  %v678_v29 = vpack.c.bf16 %v668_v22, %v667_v26  ;;  %v651_v33 = vadd.f32 %v1069_v23, %v902_v51 }
 0x1f9   :  { %v642_v27 = vpop.f32.mrf.mxu0 }
 0x1fa   :  { %v677_v28 = vpack.c.bf16 %v666_v25, %v665_v24  ;;  %v643_v31 = vadd.f32 %v902_v51, %v642_v27  ;;  %v671_v39 = vmax.f32 %v651_v33, 0.0 }
 0x1fb   :  { %v1070_v30 = vpop.f32.mrf.mxu0 }
 0x1fc   :  { %v654_v32 = vadd.f32 %v1070_v30, %v902_v51  ;;  %1095 = vmatprep.mubr.bf16.mxu1 %v677_v28  ;;  %v669_v37 = vmax.f32 %v643_v31, 0.0 }
 0x1fd   :  { %v645_v34 = vpop.f32.mrf.mxu0  ;;  %1096 = vmatmul.mubr.bf16.gmra.mxu1 %v678_v29 }
 0x1fe   :  { %v646_v35 = vadd.f32 %v902_v51, %v645_v34  ;;  %v672_v36 = vmax.f32 %v654_v32, 0.0 }
 0x200   :  { %v670_v38 = vmax.f32 %v646_v35, 0.0  ;;  %v680_v41 = vpack.c.bf16 %v672_v36, %v671_v39 }
 0x202   :  { %v679_v40 = vpack.c.bf16 %v670_v38, %v669_v37 }
 0x204   :  { %1099 = vmatprep.mubr.bf16.mxu1 %v679_v40 }
 0x205   :  { %1100 = vmatmul.mubr.bf16.gmra.mxu1 %v680_v41 }
 0x2ad   :  { %v1089_v43 = vpop.f32.mrf.mxu1 }
 0x2ae   :  { %v795_v44 = vadd.f32 %v1089_v43, %v911_v42 }
 0x2af   :  { %v786_v45 = vpop.f32.mrf.mxu1 }
 0x2b0   :  { %851 = vst [vmem:[%s1378_s9 + $0x10] sm:$0xff] %v795_v44  ;;  %v787_v46 = vadd.f32 %v911_v42, %v786_v45 }
 0x2b1   :  { %v1090_v47 = vpop.f32.mrf.mxu1 }
 0x2b2   :  { %849 = vst [vmem:[%s1378_s9] sm:$0xff] %v787_v46  ;;  %v798_v48 = vadd.f32 %v1090_v47, %v911_v42 }
 0x2b3   :  { %v789_v49 = vpop.f32.mrf.mxu1 }
 0x2b4   :  { %852 = vst [vmem:[%s1378_s9 + $0x18] sm:$0xff] %v798_v48  ;;  %v790_v50 = vadd.f32 %v911_v42, %v789_v49 }
 0x2b5   :  { %v1093_v51 = vpop.f32.mrf.mxu1 }
 0x2b6   :  { %850 = vst [vmem:[%s1378_s9 + $0x8] sm:$0xff] %v790_v50  ;;  %v811_v52 = vadd.f32 %v1093_v51, %v911_v42 }
 0x2b7   :  { %v802_v53 = vpop.f32.mrf.mxu1 }
 0x2b8   :  { %855 = vst [vmem:[%s1378_s9 + $0x30] sm:$0xff] %v811_v52  ;;  %v803_v54 = vadd.f32 %v911_v42, %v802_v53 }
 0x2b9   :  { %v1094_v55 = vpop.f32.mrf.mxu1 }
 0x2ba   :  { %853 = vst [vmem:[%s1378_s9 + $0x20] sm:$0xff] %v803_v54  ;;  %v814_v56 = vadd.f32 %v1094_v55, %v911_v42 }
 0x2bb   :  { %v805_v57 = vpop.f32.mrf.mxu1 }
 0x2bc   :  { %856 = vst [vmem:[%s1378_s9 + $0x38] sm:$0xff] %v814_v56  ;;  %v806_v58 = vadd.f32 %v911_v42, %v805_v57 }
 0x2bd   :  { %v1097_v59 = vpop.f32.mrf.mxu1 }
 0x2be   :  { %854 = vst [vmem:[%s1378_s9 + $0x28] sm:$0xff] %v806_v58  ;;  %v827_v60 = vadd.f32 %v1097_v59, %v911_v42 }
 0x2bf   :  { %v818_v61 = vpop.f32.mrf.mxu1 }
 0x2c0   :  { %859 = vst [vmem:[%s1378_s9 + $0x50] sm:$0xff] %v827_v60  ;;  %v819_v62 = vadd.f32 %v911_v42, %v818_v61 }
 0x2c1   :  { %v1098_v63 = vpop.f32.mrf.mxu1 }
 0x2c2   :  { %857 = vst [vmem:[%s1378_s9 + $0x40] sm:$0xff] %v819_v62  ;;  %v830_v0 = vadd.f32 %v1098_v63, %v911_v42 }
 0x2c3   :  { %v821_v1 = vpop.f32.mrf.mxu1 }
 0x2c4   :  { %860 = vst [vmem:[%s1378_s9 + $0x58] sm:$0xff] %v830_v0  ;;  %v822_v2 = vadd.f32 %v911_v42, %v821_v1 }
 0x2c5   :  { %v1101_v3 = vpop.f32.mrf.mxu1 }
 0x2c6   :  { %858 = vst [vmem:[%s1378_s9 + $0x48] sm:$0xff] %v822_v2  ;;  %v843_v4 = vadd.f32 %v1101_v3, %v911_v42 }
 0x2c7   :  { %v834_v5 = vpop.f32.mrf.mxu1 }
 0x2c8   :  { %863 = vst [vmem:[%s1378_s9 + $0x70] sm:$0xff] %v843_v4  ;;  %v835_v6 = vadd.f32 %v911_v42, %v834_v5 }
 0x2c9   :  { %v1102_v7 = vpop.f32.mrf.mxu1 }
 0x2ca   :  { %861 = vst [vmem:[%s1378_s9 + $0x60] sm:$0xff] %v835_v6  ;;  %v846_v8 = vadd.f32 %v1102_v7, %v911_v42 }
 0x2cb   :  { %v837_v9 = vpop.f32.mrf.mxu1 }
 0x2cc   :  { %864 = vst [vmem:[%s1378_s9 + $0x78] sm:$0xff] %v846_v8  ;;  %v838_v10 = vadd.f32 %v911_v42, %v837_v9 }
 0x2ce   :  { %862 = vst [vmem:[%s1378_s9 + $0x68] sm:$0xff] %v838_v10 }

</bundles_post_ra>
